<compile_context>
chip_gen: v6e
topology: v6e:2x2x1
jax: 0.10.0
libtpu: 0.0.40
codegen_flags: <defaults>
</compile_context>

<pallas_src>
import functools

import jax
import jax.numpy as jnp
from jax.experimental import pallas as pl
from jax.experimental.pallas import tpu as pltpu

L = 128   # feature dim after extractor
D = 64    # attention hidden dim
K = 1     # number of attention heads (classic AttnMIL uses 1)

_NEG_BIG = -1e30   # additive mask for padded rows; exp underflows to exactly 0


def _ceil_to(a, b):
    return -(-a // b) * b


def _attnmil_kernel(x_ref, mask_ref,
                    w1_ref, b1_ref, w2_ref, b2_ref,
                    wa1_ref, ba1_ref, wa2_ref, ba2_ref,
                    logits_ref, m_ref, l_ref, pool_ref,
                    m_scr, l_scr, acc_scr):
    # grid = (num_splits, steps): axis 0 = bag half ("parallel", per-core on v7x),
    #                             axis 1 = tiles within the half ("arbitrary" reduction).
    i = pl.program_id(1)

    @pl.when(i == 0)
    def _init():
        m_scr[...] = jnp.full_like(m_scr, _NEG_BIG)
        l_scr[...] = jnp.zeros_like(l_scr)
        acc_scr[...] = jnp.zeros_like(acc_scr)

    # ---- feature extractor: Linear(F,256) -> ReLU -> Linear(256,L) -> ReLU ----
    # bf16 operands + f32 MXU accumulation; bias-add + ReLU epilogues in bf16.
    x = x_ref[...]                                                        # (TILE_N, F_pad) bf16
    h1 = jnp.dot(x, w1_ref[...], preferred_element_type=jnp.float32)
    h1 = jnp.maximum(h1.astype(jnp.bfloat16) + b1_ref[...], 0)           # (TILE_N, 256) bf16
    hf = jnp.dot(h1, w2_ref[...], preferred_element_type=jnp.float32)
    hf = jnp.maximum(hf.astype(jnp.bfloat16) + b2_ref[...], 0)           # (TILE_N, L) bf16

    # ---- attention head: Linear(L,D) -> Tanh -> Linear(D,K=1) ----
    ah = jnp.tanh(
        jnp.dot(hf, wa1_ref[...], preferred_element_type=jnp.float32) + ba1_ref[...])  # (TILE_N, D) f32

    # Logits directly in lane-dense row form (1, TILE_N): contract D with wa2 stored as (K, D).
    # NOTE(perf review): verify with pl.lower_as_mlir that Mosaic doesn't emit a full
    # (TILE_N, 64) XLU transpose of `ah` here; if it does, compute ah @ wa2.T -> (TILE_N, 1)
    # and transpose only the 1-wide column.
    logits = jax.lax.dot_general(
        wa2_ref[...], ah, (((1,), (1,)), ((), ())),
        preferred_element_type=jnp.float32) + ba2_ref[...]               # (1, TILE_N) f32

    # Padded rows: additive -1e30 bias precomputed in the wrapper (no per-step iota/cmp/select).
    logits = logits + mask_ref[...]

    logits_ref[...] = logits   # raw masked logits, lane-dense; softmax finished in the wrapper

    # ---- online softmax + weighted pooling accumulator (per bag-half) ----
    m_prev = m_scr[...]                                                   # (1, 1)
    m_new = jnp.maximum(m_prev, jnp.max(logits, axis=1, keepdims=True))
    alpha = jnp.exp(m_prev - m_new)
    p = jnp.exp(logits - m_new)                                           # (1, TILE_N) f32
    l_scr[...] = alpha * l_scr[...] + jnp.sum(p, axis=1, keepdims=True)
    acc_scr[...] = alpha * acc_scr[...] + jnp.dot(
        p.astype(jnp.bfloat16), hf, preferred_element_type=jnp.float32)  # (1, L) f32 acc

    m_scr[...] = m_new

    # ---- emit this half's partial softmax stats + unnormalized pool on the last step ----
    @pl.when(i == pl.num_programs(1) - 1)
    def _finalize():
        m_ref[...] = m_scr[...][None]        # (1, 1, 1)
        l_ref[...] = l_scr[...][None]        # (1, 1, 1)
        pool_ref[...] = acc_scr[...][None]   # (1, 1, L)


def _pick_vmem_limit(want_bytes):
    """Generation-aware VMEM limit: clamp the requested footprint to ~85% of physical VMEM."""
    phys = 128 * 1024 * 1024
    try:
        phys = int(getattr(pltpu.get_tpu_info(), "vmem_capacity_bytes", phys))
    except Exception:
        pass
    cap = max(int(phys * 0.85), 16 * 1024 * 1024)
    return min(max(int(want_bytes), 32 * 1024 * 1024), cap)


def attn_mil_forward(x, params, *, tile_n=2048):
    """Returns (Y_prob (1, num_class), A (K=1, N)) — same semantics as AttnMIL.forward."""
    n, f = x.shape
    num_class = params["wc"].shape[1]
    assert n >= 1
    assert tile_n % 128 == 0, "tile_n must be a multiple of 128 (lane-dense logits output)"

    # Split the bag in two halves (uses both TensorCores on v7x, harmless on v5e/v6e).
    s = 2 if n > 128 else 1
    half = -(-n // s)                                         # ceil(n / s)
    tile = min(tile_n, max(128, _ceil_to(half, 128)))         # don't over-pad tiny bags
    per_core = _ceil_to(half, tile)
    steps = per_core // tile
    n_pad = s * per_core

    # Lane-dense feature dim for the dominant x@w1 MXU contraction.
    f_pad = _ceil_to(f, 128)

    # Stream x as bf16 (halves HBM bytes of the only large DMA); zero-pad rows and features.
    x_bf = jnp.pad(x, ((0, n_pad - n), (0, f_pad - f))).astype(jnp.bfloat16)
    w1 = jnp.pad(params["w1"], ((0, f_pad - f), (0, 0))).astype(jnp.bfloat16)
    w2 = params["w2"].astype(jnp.bfloat16)
    wa1 = params["wa1"].astype(jnp.bfloat16)
    b1 = params["b1"].astype(jnp.bfloat16)   # bf16 epilogues (fastest on v6e/v7x, correct on v5e)
    b2 = params["b2"].astype(jnp.bfloat16)
    ba1 = params["ba1"].astype(jnp.float32)
    wa2 = params["wa2"].astype(jnp.float32)
    ba2 = params["ba2"].astype(jnp.float32)

    # Additive mask row: 0 on valid rows, -1e30 on padded rows.
    mask_bias = jnp.where(jnp.arange(n_pad) < n, 0.0, _NEG_BIG)
    mask_bias = mask_bias.astype(jnp.float32).reshape(1, n_pad)

    def const(shape):  # resident across the grid: constant block index, no re-DMA
        return pl.BlockSpec(shape, lambda c, i: (0,) * len(shape))

    in_specs = [
        pl.BlockSpec((tile, f_pad), lambda c, i: (c * steps + i, 0)),   # x tile
        pl.BlockSpec((1, tile), lambda c, i: (0, c * steps + i)),       # padded-row mask bias
        const(w1.shape), const(b1.shape),
        const(w2.shape), const(b2.shape),
        const(wa1.shape), const(ba1.shape),
        const(wa2.shape), const(ba2.shape),
    ]
    out_specs = (
        pl.BlockSpec((1, tile), lambda c, i: (0, c * steps + i)),       # raw logits, lane-dense
        pl.BlockSpec((1, 1, 1), lambda c, i: (c, 0, 0)),                # per-half running max  m
        pl.BlockSpec((1, 1, 1), lambda c, i: (c, 0, 0)),                # per-half denominator  l
        pl.BlockSpec((1, 1, L), lambda c, i: (c, 0, 0)),                # per-half unnorm. pool
    )
    out_shape = (
        jax.ShapeDtypeStruct((1, n_pad), jnp.float32),
        jax.ShapeDtypeStruct((s, 1, 1), jnp.float32),
        jax.ShapeDtypeStruct((s, 1, 1), jnp.float32),
        jax.ShapeDtypeStruct((s, 1, L), jnp.float32),
    )

    # VMEM footprint estimate (2 buffers per input) -> generation-aware limit.
    vmem_est = (
        2 * tile * f_pad * 2                               # x tile, double-buffered, bf16
        + 2 * (f_pad * 256 + 256 * L + L * D) * 2          # resident bf16 weights (2 bufs each)
        + 2 * (256 + L) * 2 + 2 * (D + 2 * K) * 4          # biases
        + 4 * tile * 4                                     # mask row + logits tile (2 bufs each)
        + tile * (256 * 6 + L * 6 + D * 4 + 16)            # f32/bf16 intermediates
        + (L + 8) * 4 * 4                                  # partial outputs + scratch
    )
    vmem_limit = _pick_vmem_limit(vmem_est + (8 << 20))

    flops = 2 * n_pad * (f_pad * 256 + 256 * L + L * D + D * K + L) + 2 * L * num_class
    bytes_accessed = (
        2 * (x_bf.size + w1.size + w2.size + wa1.size + b1.size + b2.size)
        + 4 * (ba1.size + wa2.size + ba2.size + mask_bias.size
               + n_pad + s * (L + 2)))

    logits_row, m_part, l_part, pool_part = pl.pallas_call(
        _attnmil_kernel,
        out_shape=out_shape,
        grid_spec=pltpu.PrefetchScalarGridSpec(
            num_scalar_prefetch=0,
            grid=(s, steps),
            in_specs=in_specs,
            out_specs=out_specs,
            scratch_shapes=[
                pltpu.VMEM((1, 1), jnp.float32),    # running max
                pltpu.VMEM((1, 1), jnp.float32),    # running denominator
                pltpu.VMEM((1, L), jnp.float32),    # running weighted pool
            ],
        ),
        compiler_params=pltpu.CompilerParams(
            # axis 0: independent bag halves (split across TCs on v7x);
            # axis 1: online-softmax / pooling reduction over the half.
            dimension_semantics=("parallel", "arbitrary"),
            vmem_limit_bytes=vmem_limit,
        ),
        cost_estimate=pl.CostEstimate(
            flops=flops, transcendentals=n_pad * (D + 1), bytes_accessed=bytes_accessed),
    )(x_bf, mask_bias, w1, b1, w2, b2, wa1, ba1, wa2, ba2)

    # ---- wrapper finalize: 2-way log-sum-exp merge, softmax, classifier (all tiny) ----
    m_part = m_part[:, 0, :]        # (s, 1)
    l_part = l_part[:, 0, :]        # (s, 1)
    pool_part = pool_part[:, 0, :]  # (s, L)

    m_glob = jnp.max(m_part, axis=0, keepdims=True)                      # (1, 1)
    scale = jnp.exp(m_part - m_glob)                                     # (s, 1)
    l_glob = jnp.sum(l_part * scale, axis=0, keepdims=True)              # (1, 1)
    pooled = jnp.sum(pool_part * scale, axis=0, keepdims=True) / l_glob  # (1, L)

    y_prob = jnp.dot(pooled, params["wc"]) + params["bc"]                # (1, num_class)
    attn = jnp.exp(logits_row - m_glob) / l_glob                         # (1, n_pad)
    return y_prob, attn[:, :n]


def init_params(key, in_features, num_class):
    ks = jax.random.split(key, 10)
    std = 0.1

    def w(k, shape):
        return (std * jax.random.normal(k, shape)).astype(jnp.float32)

    return {
        "w1":  w(ks[0], (in_features, 256)), "b1":  w(ks[1], (1, 256)),
        "w2":  w(ks[2], (256, L)),           "b2":  w(ks[3], (1, L)),
        "wa1": w(ks[4], (L, D)),             "ba1": w(ks[5], (1, D)),
        "wa2": w(ks[6], (K, D)),             "ba2": w(ks[7], (1, K)),   # wa2 in (out,in) row form
        "wc":  w(ks[8], (L * K, num_class)), "bc":  w(ks[9], (1, num_class)),
    }


def _ref_forward(x, params):
    """Pure-JAX reference with the same bf16 matmul/epilogue policy as the kernel."""
    bf, f32 = jnp.bfloat16, jnp.float32
    h1 = jnp.dot(x.astype(bf), params["w1"].astype(bf), preferred_element_type=f32)
    h1 = jnp.maximum(h1.astype(bf) + params["b1"].astype(bf), 0)
    hf = jnp.dot(h1, params["w2"].astype(bf), preferred_element_type=f32)
    hf = jnp.maximum(hf.astype(bf) + params["b2"].astype(bf), 0)
    ah = jnp.tanh(jnp.dot(hf, params["wa1"].astype(bf),
                          preferred_element_type=f32) + params["ba1"])
    logits = jnp.dot(ah, params["wa2"].T) + params["ba2"]       # (N, 1)
    a = jax.nn.softmax(jnp.transpose(logits), axis=1)           # (1, N)
    pooled = jnp.dot(a, hf.astype(f32))                         # (1, L)
    y = jnp.dot(pooled, params["wc"]) + params["bc"]
    return y, a


if __name__ == "__main__":
    key = jax.random.PRNGKey(0)
    k_x, k_p = jax.random.split(key)

    # Small demo: bag of 200 instances, 32 features -> split into 2 halves of 128 padded rows,
    # exercising the parallel-halves grid, the additive padded-row mask and the wrapper merge.
    N, in_features, num_class = 200, 32, 4
    x = jax.random.normal(k_x, (N, in_features), dtype=jnp.float32)
    params = init_params(k_p, in_features, num_class)

    fwd = jax.jit(attn_mil_forward)
    y_prob, A = fwd(x, params)
    jax.block_until_ready((y_prob, A))

    y_ref, a_ref = _ref_forward(x, params)

    assert y_prob.shape == (1, num_class)
    assert A.shape == (K, N)
    # attention weights must sum to 1 over the bag
    assert abs(float(jnp.sum(A)) - 1.0) < 1e-3
    assert jnp.allclose(A, a_ref, atol=5e-4, rtol=5e-3)
    assert jnp.allclose(y_prob, y_ref, atol=5e-3, rtol=5e-3)

    print("KERNEL_OK")
</pallas_src>

<mosaic_0001>
module attributes {stable_mosaic.version = 11 : i64} {
  func.func @_attnmil_kernel(%arg0: i32, %arg1: i32, %arg2: memref<128x128xbf16, #tpu.memory_space<vmem>>, %arg3: memref<1x128xf32, #tpu.memory_space<vmem>>, %arg4: memref<128x256xbf16, #tpu.memory_space<vmem>>, %arg5: memref<1x256xbf16, #tpu.memory_space<vmem>>, %arg6: memref<256x128xbf16, #tpu.memory_space<vmem>>, %arg7: memref<1x128xbf16, #tpu.memory_space<vmem>>, %arg8: memref<128x64xbf16, #tpu.memory_space<vmem>>, %arg9: memref<1x64xf32, #tpu.memory_space<vmem>>, %arg10: memref<1x64xf32, #tpu.memory_space<vmem>>, %arg11: memref<1x1xf32, #tpu.memory_space<vmem>>, %arg12: memref<1x128xf32, #tpu.memory_space<vmem>>, %arg13: memref<1x1x1xf32, #tpu.memory_space<vmem>>, %arg14: memref<1x1x1xf32, #tpu.memory_space<vmem>>, %arg15: memref<1x1x128xf32, #tpu.memory_space<vmem>>, %arg16: memref<1x1xf32, #tpu.memory_space<vmem>>, %arg17: memref<1x1xf32, #tpu.memory_space<vmem>>, %arg18: memref<1x128xf32, #tpu.memory_space<vmem>>) attributes {dimension_semantics = [#tpu.dimension_semantics<parallel>, #tpu.dimension_semantics<arbitrary>], iteration_bounds = array<i64: 2, 1>, scalar_prefetch = 0 : i64, scratch_operands = 3 : i64, tpu.core_type = #tpu.core_type<tc>, window_params = [{transform_indices = @transform_0, window_bounds = array<i64: 128, 128>}, {transform_indices = @transform_1, window_bounds = array<i64: 1, 128>}, {pipeline_mode = #tpu.pipeline_mode<synchronous>, transform_indices = @transform_2, window_bounds = array<i64: 128, 256>}, {pipeline_mode = #tpu.pipeline_mode<synchronous>, transform_indices = @transform_3, window_bounds = array<i64: 1, 256>}, {pipeline_mode = #tpu.pipeline_mode<synchronous>, transform_indices = @transform_4, window_bounds = array<i64: 256, 128>}, {pipeline_mode = #tpu.pipeline_mode<synchronous>, transform_indices = @transform_5, window_bounds = array<i64: 1, 128>}, {pipeline_mode = #tpu.pipeline_mode<synchronous>, transform_indices = @transform_6, window_bounds = array<i64: 128, 64>}, {pipeline_mode = #tpu.pipeline_mode<synchronous>, transform_indices = @transform_7, window_bounds = array<i64: 1, 64>}, {pipeline_mode = #tpu.pipeline_mode<synchronous>, transform_indices = @transform_8, window_bounds = array<i64: 1, 64>}, {pipeline_mode = #tpu.pipeline_mode<synchronous>, transform_indices = @transform_9, window_bounds = array<i64: 1, 1>}, {transform_indices = @transform_10, window_bounds = array<i64: 1, 128>}, {transform_indices = @transform_11, window_bounds = array<i64: 1, 1, 1>}, {transform_indices = @transform_12, window_bounds = array<i64: 1, 1, 1>}, {transform_indices = @transform_13, window_bounds = array<i64: 1, 1, 128>}]} {
    %c0_i32 = arith.constant 0 : i32
    %0 = arith.cmpi eq, %arg1, %c0_i32 : i32
    %1 = arith.extui %0 : i1 to i32
    %c0_i32_0 = arith.constant 0 : i32
    %2 = arith.cmpi ne, %1, %c0_i32_0 : i32
    scf.if %2 {
      %cst_44 = arith.constant -1.000000e+30 : f32
      %60 = vector.broadcast %cst_44 : f32 to vector<1x1xf32>
      %c0_45 = arith.constant 0 : index
      %c0_46 = arith.constant 0 : index
      %61 = vector.load %arg16[%c0_45, %c0_46] : memref<1x1xf32, #tpu.memory_space<vmem>>, vector<1x1xf32>
      tpu.vector_store %arg16[%c0_45, %c0_46], %60 {strides = array<i32>} : memref<1x1xf32, #tpu.memory_space<vmem>>, vector<1x1xf32>,
      %cst_47 = arith.constant 0.000000e+00 : f32
      %62 = vector.broadcast %cst_47 : f32 to vector<1x1xf32>
      %c0_48 = arith.constant 0 : index
      %c0_49 = arith.constant 0 : index
      %63 = vector.load %arg17[%c0_48, %c0_49] : memref<1x1xf32, #tpu.memory_space<vmem>>, vector<1x1xf32>
      tpu.vector_store %arg17[%c0_48, %c0_49], %62 {strides = array<i32>} : memref<1x1xf32, #tpu.memory_space<vmem>>, vector<1x1xf32>,
      %cst_50 = arith.constant 0.000000e+00 : f32
      %64 = vector.broadcast %cst_50 : f32 to vector<1x128xf32>
      %c0_51 = arith.constant 0 : index
      %c0_52 = arith.constant 0 : index
      %65 = vector.load %arg18[%c0_51, %c0_52] : memref<1x128xf32, #tpu.memory_space<vmem>>, vector<1x128xf32>
      tpu.vector_store %arg18[%c0_51, %c0_52], %64 {strides = array<i32>} : memref<1x128xf32, #tpu.memory_space<vmem>>, vector<1x128xf32>,
    } else {
    }
    %c0 = arith.constant 0 : index
    %c0_1 = arith.constant 0 : index
    %3 = vector.load %arg2[%c0, %c0_1] : memref<128x128xbf16, #tpu.memory_space<vmem>>, vector<128x128xbf16>
    %c0_2 = arith.constant 0 : index
    %c0_3 = arith.constant 0 : index
    %4 = vector.load %arg4[%c0_2, %c0_3] : memref<128x256xbf16, #tpu.memory_space<vmem>>, vector<128x256xbf16>
    %cst = arith.constant dense<0.000000e+00> : vector<128x256xf32>
    %5 = tpu.matmul %3, %4, %cst {dimension_numbers = #tpu.dot_dimension_numbers<[1], [0], [0], [1], [0, 0, 1, 1], [], []>} : vector<128x128xbf16>, vector<128x256xbf16>, vector<128x256xf32> -> vector<128x256xf32>
    %6 = arith.truncf %5 : vector<128x256xf32> to vector<128x256xbf16>
    %c0_4 = arith.constant 0 : index
    %c0_5 = arith.constant 0 : index
    %7 = vector.load %arg5[%c0_4, %c0_5] : memref<1x256xbf16, #tpu.memory_space<vmem>>, vector<1x256xbf16>
    %8 = vector.broadcast %7 : vector<1x256xbf16> to vector<128x256xbf16>
    %9 = arith.addf %6, %8 : vector<128x256xbf16>
    %cst_6 = arith.constant 0.000000e+00 : bf16
    %10 = vector.broadcast %cst_6 : bf16 to vector<128x256xbf16>
    %11 = arith.maximumf %9, %10 : vector<128x256xbf16>
    %c0_7 = arith.constant 0 : index
    %c0_8 = arith.constant 0 : index
    %12 = vector.load %arg6[%c0_7, %c0_8] : memref<256x128xbf16, #tpu.memory_space<vmem>>, vector<256x128xbf16>
    %cst_9 = arith.constant dense<0.000000e+00> : vector<128x128xf32>
    %13 = tpu.matmul %11, %12, %cst_9 {dimension_numbers = #tpu.dot_dimension_numbers<[1], [0], [0], [1], [0, 0, 1, 1], [], []>} : vector<128x256xbf16>, vector<256x128xbf16>, vector<128x128xf32> -> vector<128x128xf32>
    %14 = arith.truncf %13 : vector<128x128xf32> to vector<128x128xbf16>
    %c0_10 = arith.constant 0 : index
    %c0_11 = arith.constant 0 : index
    %15 = vector.load %arg7[%c0_10, %c0_11] : memref<1x128xbf16, #tpu.memory_space<vmem>>, vector<1x128xbf16>
    %16 = vector.broadcast %15 : vector<1x128xbf16> to vector<128x128xbf16>
    %17 = arith.addf %14, %16 : vector<128x128xbf16>
    %cst_12 = arith.constant 0.000000e+00 : bf16
    %18 = vector.broadcast %cst_12 : bf16 to vector<128x128xbf16>
    %19 = arith.maximumf %17, %18 : vector<128x128xbf16>
    %c0_13 = arith.constant 0 : index
    %c0_14 = arith.constant 0 : index
    %20 = vector.load %arg8[%c0_13, %c0_14] : memref<128x64xbf16, #tpu.memory_space<vmem>>, vector<128x64xbf16>
    %cst_15 = arith.constant dense<0.000000e+00> : vector<128x64xf32>
    %21 = tpu.matmul %19, %20, %cst_15 {dimension_numbers = #tpu.dot_dimension_numbers<[1], [0], [0], [1], [0, 0, 1, 1], [], []>} : vector<128x128xbf16>, vector<128x64xbf16>, vector<128x64xf32> -> vector<128x64xf32>
    %c0_16 = arith.constant 0 : index
    %c0_17 = arith.constant 0 : index
    %22 = vector.load %arg9[%c0_16, %c0_17] : memref<1x64xf32, #tpu.memory_space<vmem>>, vector<1x64xf32>
    %23 = vector.broadcast %22 : vector<1x64xf32> to vector<128x64xf32>
    %24 = arith.addf %21, %23 : vector<128x64xf32>
    %25 = math.tanh %24 : vector<128x64xf32>
    %c0_18 = arith.constant 0 : index
    %c0_19 = arith.constant 0 : index
    %26 = vector.load %arg10[%c0_18, %c0_19] : memref<1x64xf32, #tpu.memory_space<vmem>>, vector<1x64xf32>
    %cst_20 = arith.constant dense<0.000000e+00> : vector<1x128xf32>
    %27 = tpu.matmul %26, %25, %cst_20 {dimension_numbers = #tpu.dot_dimension_numbers<[1], [1], [0], [0], [0, 0, 1, 0], [], []>} : vector<1x64xf32>, vector<128x64xf32>, vector<1x128xf32> -> vector<1x128xf32>
    %c0_21 = arith.constant 0 : index
    %c0_22 = arith.constant 0 : index
    %28 = vector.load %arg11[%c0_21, %c0_22] : memref<1x1xf32, #tpu.memory_space<vmem>>, vector<1x1xf32>
    %29 = vector.broadcast %28 : vector<1x1xf32> to vector<1x128xf32>
    %30 = arith.addf %27, %29 : vector<1x128xf32>
    %c0_23 = arith.constant 0 : index
    %c0_24 = arith.constant 0 : index
    %31 = vector.load %arg3[%c0_23, %c0_24] : memref<1x128xf32, #tpu.memory_space<vmem>>, vector<1x128xf32>
    %32 = arith.addf %30, %31 : vector<1x128xf32>
    %c0_25 = arith.constant 0 : index
    %c0_26 = arith.constant 0 : index
    %33 = vector.load %arg12[%c0_25, %c0_26] : memref<1x128xf32, #tpu.memory_space<vmem>>, vector<1x128xf32>
    tpu.vector_store %arg12[%c0_25, %c0_26], %32 {strides = array<i32>} : memref<1x128xf32, #tpu.memory_space<vmem>>, vector<1x128xf32>,
    %c0_27 = arith.constant 0 : index
    %c0_28 = arith.constant 0 : index
    %34 = vector.load %arg16[%c0_27, %c0_28] : memref<1x1xf32, #tpu.memory_space<vmem>>, vector<1x1xf32>
    %cst_29 = arith.constant dense<0xFF800000> : vector<1xf32>
    %35 = vector.multi_reduction <maximumf>, %32, %cst_29 [1] : vector<1x128xf32> to vector<1xf32>
    %36 = vector.shape_cast %35 : vector<1xf32> to vector<1x1xf32>
    %37 = arith.maximumf %34, %36 : vector<1x1xf32>
    %38 = arith.subf %34, %37 : vector<1x1xf32>
    %39 = math.exp %38 : vector<1x1xf32>
    %40 = vector.broadcast %37 : vector<1x1xf32> to vector<1x128xf32>
    %41 = arith.subf %32, %40 : vector<1x128xf32>
    %42 = math.exp %41 : vector<1x128xf32>
    %c0_30 = arith.constant 0 : index
    %c0_31 = arith.constant 0 : index
    %43 = vector.load %arg17[%c0_30, %c0_31] : memref<1x1xf32, #tpu.memory_space<vmem>>, vector<1x1xf32>
    %44 = arith.mulf %39, %43 : vector<1x1xf32>
    %cst_32 = arith.constant dense<0.000000e+00> : vector<1xf32>
    %45 = vector.multi_reduction <add>, %42, %cst_32 [1] : vector<1x128xf32> to vector<1xf32>
    %46 = vector.shape_cast %45 : vector<1xf32> to vector<1x1xf32>
    %47 = arith.addf %44, %46 : vector<1x1xf32>
    %c0_33 = arith.constant 0 : index
    %c0_34 = arith.constant 0 : index
    %48 = vector.load %arg17[%c0_33, %c0_34] : memref<1x1xf32, #tpu.memory_space<vmem>>, vector<1x1xf32>
    tpu.vector_store %arg17[%c0_33, %c0_34], %47 {strides = array<i32>} : memref<1x1xf32, #tpu.memory_space<vmem>>, vector<1x1xf32>,
    %c0_35 = arith.constant 0 : index
    %c0_36 = arith.constant 0 : index
    %49 = vector.load %arg18[%c0_35, %c0_36] : memref<1x128xf32, #tpu.memory_space<vmem>>, vector<1x128xf32>
    %50 = vector.broadcast %39 : vector<1x1xf32> to vector<1x128xf32>
    %51 = arith.mulf %50, %49 : vector<1x128xf32>
    %52 = arith.truncf %42 : vector<1x128xf32> to vector<1x128xbf16>
    %cst_37 = arith.constant dense<0.000000e+00> : vector<1x128xf32>
    %53 = tpu.matmul %52, %19, %cst_37 {dimension_numbers = #tpu.dot_dimension_numbers<[1], [0], [0], [1], [0, 0, 1, 1], [], []>} : vector<1x128xbf16>, vector<128x128xbf16>, vector<1x128xf32> -> vector<1x128xf32>
    %54 = arith.addf %51, %53 : vector<1x128xf32>
    %c0_38 = arith.constant 0 : index
    %c0_39 = arith.constant 0 : index
    %55 = vector.load %arg18[%c0_38, %c0_39] : memref<1x128xf32, #tpu.memory_space<vmem>>, vector<1x128xf32>
    tpu.vector_store %arg18[%c0_38, %c0_39], %54 {strides = array<i32>} : memref<1x128xf32, #tpu.memory_space<vmem>>, vector<1x128xf32>,
    %c0_40 = arith.constant 0 : index
    %c0_41 = arith.constant 0 : index
    %56 = vector.load %arg16[%c0_40, %c0_41] : memref<1x1xf32, #tpu.memory_space<vmem>>, vector<1x1xf32>
    tpu.vector_store %arg16[%c0_40, %c0_41], %37 {strides = array<i32>} : memref<1x1xf32, #tpu.memory_space<vmem>>, vector<1x1xf32>,
    %c0_i32_42 = arith.constant 0 : i32
    %57 = arith.cmpi eq, %arg1, %c0_i32_42 : i32
    %58 = arith.extui %57 : i1 to i32
    %c0_i32_43 = arith.constant 0 : i32
    %59 = arith.cmpi ne, %58, %c0_i32_43 : i32
    scf.if %59 {
      %c0_44 = arith.constant 0 : index
      %c0_45 = arith.constant 0 : index
      %60 = vector.load %arg16[%c0_44, %c0_45] : memref<1x1xf32, #tpu.memory_space<vmem>>, vector<1x1xf32>
      %61 = vector.shape_cast %60 : vector<1x1xf32> to vector<1x1x1xf32>
      %c0_46 = arith.constant 0 : index
      %c0_47 = arith.constant 0 : index
      %c0_48 = arith.constant 0 : index
      %62 = vector.load %arg13[%c0_46, %c0_47, %c0_48] : memref<1x1x1xf32, #tpu.memory_space<vmem>>, vector<1x1x1xf32>
      tpu.vector_store %arg13[%c0_46, %c0_47, %c0_48], %61 {strides = array<i32>} : memref<1x1x1xf32, #tpu.memory_space<vmem>>, vector<1x1x1xf32>,
      %c0_49 = arith.constant 0 : index
      %c0_50 = arith.constant 0 : index
      %63 = vector.load %arg17[%c0_49, %c0_50] : memref<1x1xf32, #tpu.memory_space<vmem>>, vector<1x1xf32>
      %64 = vector.shape_cast %63 : vector<1x1xf32> to vector<1x1x1xf32>
      %c0_51 = arith.constant 0 : index
      %c0_52 = arith.constant 0 : index
      %c0_53 = arith.constant 0 : index
      %65 = vector.load %arg14[%c0_51, %c0_52, %c0_53] : memref<1x1x1xf32, #tpu.memory_space<vmem>>, vector<1x1x1xf32>
      tpu.vector_store %arg14[%c0_51, %c0_52, %c0_53], %64 {strides = array<i32>} : memref<1x1x1xf32, #tpu.memory_space<vmem>>, vector<1x1x1xf32>,
      %c0_54 = arith.constant 0 : index
      %c0_55 = arith.constant 0 : index
      %66 = vector.load %arg18[%c0_54, %c0_55] : memref<1x128xf32, #tpu.memory_space<vmem>>, vector<1x128xf32>
      %67 = vector.shape_cast %66 : vector<1x128xf32> to vector<1x1x128xf32>
      %c0_56 = arith.constant 0 : index
      %c0_57 = arith.constant 0 : index
      %c0_58 = arith.constant 0 : index
      %68 = vector.load %arg15[%c0_56, %c0_57, %c0_58] : memref<1x1x128xf32, #tpu.memory_space<vmem>>, vector<1x1x128xf32>
      tpu.vector_store %arg15[%c0_56, %c0_57, %c0_58], %67 {strides = array<i32>} : memref<1x1x128xf32, #tpu.memory_space<vmem>>, vector<1x1x128xf32>,
    } else {
    }
    return
  }
  func.func @transform_0(%arg0: i32, %arg1: i32) -> (i32, i32) {
    %c1_i32 = arith.constant 1 : i32
    %0 = arith.muli %arg0, %c1_i32 : i32
    %1 = arith.addi %0, %arg1 : i32
    %c0_i32 = arith.constant 0 : i32
    %c0_i32_0 = arith.constant 0 : i32
    return %1, %c0_i32 : i32, i32
  }
  func.func @transform_1(%arg0: i32, %arg1: i32) -> (i32, i32) {
    %c1_i32 = arith.constant 1 : i32
    %0 = arith.muli %arg0, %c1_i32 : i32
    %1 = arith.addi %0, %arg1 : i32
    %c0_i32 = arith.constant 0 : i32
    %c0_i32_0 = arith.constant 0 : i32
    return %c0_i32, %1 : i32, i32
  }
  func.func @transform_2(%arg0: i32, %arg1: i32) -> (i32, i32) {
    %c0_i32 = arith.constant 0 : i32
    %c0_i32_0 = arith.constant 0 : i32
    %c0_i32_1 = arith.constant 0 : i32
    return %c0_i32, %c0_i32_0 : i32, i32
  }
  func.func @transform_3(%arg0: i32, %arg1: i32) -> (i32, i32) {
    %c0_i32 = arith.constant 0 : i32
    %c0_i32_0 = arith.constant 0 : i32
    %c0_i32_1 = arith.constant 0 : i32
    return %c0_i32, %c0_i32_0 : i32, i32
  }
  func.func @transform_4(%arg0: i32, %arg1: i32) -> (i32, i32) {
    %c0_i32 = arith.constant 0 : i32
    %c0_i32_0 = arith.constant 0 : i32
    %c0_i32_1 = arith.constant 0 : i32
    return %c0_i32, %c0_i32_0 : i32, i32
  }
  func.func @transform_5(%arg0: i32, %arg1: i32) -> (i32, i32) {
    %c0_i32 = arith.constant 0 : i32
    %c0_i32_0 = arith.constant 0 : i32
    %c0_i32_1 = arith.constant 0 : i32
    return %c0_i32, %c0_i32_0 : i32, i32
  }
  func.func @transform_6(%arg0: i32, %arg1: i32) -> (i32, i32) {
    %c0_i32 = arith.constant 0 : i32
    %c0_i32_0 = arith.constant 0 : i32
    %c0_i32_1 = arith.constant 0 : i32
    return %c0_i32, %c0_i32_0 : i32, i32
  }
  func.func @transform_7(%arg0: i32, %arg1: i32) -> (i32, i32) {
    %c0_i32 = arith.constant 0 : i32
    %c0_i32_0 = arith.constant 0 : i32
    %c0_i32_1 = arith.constant 0 : i32
    return %c0_i32, %c0_i32_0 : i32, i32
  }
  func.func @transform_8(%arg0: i32, %arg1: i32) -> (i32, i32) {
    %c0_i32 = arith.constant 0 : i32
    %c0_i32_0 = arith.constant 0 : i32
    %c0_i32_1 = arith.constant 0 : i32
    return %c0_i32, %c0_i32_0 : i32, i32
  }
  func.func @transform_9(%arg0: i32, %arg1: i32) -> (i32, i32) {
    %c0_i32 = arith.constant 0 : i32
    %c0_i32_0 = arith.constant 0 : i32
    %c0_i32_1 = arith.constant 0 : i32
    return %c0_i32, %c0_i32_0 : i32, i32
  }
  func.func @transform_10(%arg0: i32, %arg1: i32) -> (i32, i32) {
    %c1_i32 = arith.constant 1 : i32
    %0 = arith.muli %arg0, %c1_i32 : i32
    %1 = arith.addi %0, %arg1 : i32
    %c0_i32 = arith.constant 0 : i32
    %c0_i32_0 = arith.constant 0 : i32
    return %c0_i32, %1 : i32, i32
  }
  func.func @transform_11(%arg0: i32, %arg1: i32) -> (i32, i32, i32) {
    %c0_i32 = arith.constant 0 : i32
    %c0_i32_0 = arith.constant 0 : i32
    %c0_i32_1 = arith.constant 0 : i32
    return %arg0, %c0_i32, %c0_i32_0 : i32, i32, i32
  }
  func.func @transform_12(%arg0: i32, %arg1: i32) -> (i32, i32, i32) {
    %c0_i32 = arith.constant 0 : i32
    %c0_i32_0 = arith.constant 0 : i32
    %c0_i32_1 = arith.constant 0 : i32
    return %arg0, %c0_i32, %c0_i32_0 : i32, i32, i32
  }
  func.func @transform_13(%arg0: i32, %arg1: i32) -> (i32, i32, i32) {
    %c0_i32 = arith.constant 0 : i32
    %c0_i32_0 = arith.constant 0 : i32
    %c0_i32_1 = arith.constant 0 : i32
    return %arg0, %c0_i32, %c0_i32_0 : i32, i32, i32
  }
}

</mosaic_0001>

<bundles_post_ra>
// kernel: attn_mil_forward.1
= control target key start
LH: loop header
LB: loop body
LE: loop exit
PB: predicated region body
PF: predicated region fallthrough
CT: control target
= control target key end

     0   :  { %s2202_s27 = smov 0   ;;  %s2204_s28 = smov 0   ;;  %s2573_s0 = inlined_call_operand.vmem [shape: bf16[256,128], index: 0, kind: input, shape index: {}]   ;;  %s2574_s1 = inlined_call_operand.vmem [shape: f32[1,256], index: 1, kind: input, shape index: {}]   ;;  %s2575_s2 = inlined_call_operand.vmem [shape: bf16[128,256], index: 2, kind: input, shape index: {}]   ;;  %s2576_s3 = inlined_call_operand.vmem [shape: bf16[1,256], index: 3, kind: input, shape index: {}]   ;;  %s2577_s4 = inlined_call_operand.vmem [shape: bf16[256,128], index: 4, kind: input, shape index: {}]   ;;  %s2578_s5 = inlined_call_operand.vmem [shape: bf16[1,128], index: 5, kind: input, shape index: {}]   ;;  %s2579_s6 = inlined_call_operand.vmem [shape: bf16[128,64], index: 6, kind: input, shape index: {}]   ;;  %s2580_s7 = inlined_call_operand.vmem [shape: f32[1,64], index: 7, kind: input, shape index: {}]   ;;  %s2581_s8 = inlined_call_operand.vmem [shape: f32[1,64], index: 8, kind: input, shape index: {}]   ;;  %s2582_s9 = inlined_call_operand.<no memory space> [shape: f32[1,1], index: 9, kind: input, shape index: {}]   ;;  %s2583_s10 = inlined_call_operand.vmem [shape: f32[1,256], index: 10, kind: output, shape index: {0}]   ;;  %s2584_s11 = inlined_call_operand.vmem [shape: f32[2,1,1], index: 11, kind: output, shape index: {1}]   ;;  %s2585_s12 = inlined_call_operand.vmem [shape: f32[2,1,1], index: 12, kind: output, shape index: {2}]   ;;  %s2586_s13 = inlined_call_operand.vmem [shape: f32[2,1,128], index: 13, kind: output, shape index: {3}]  }
   0x1   :  { %v19_v0 = vstv %s2582_s9  ;;  %s2206_s29 = smov 0  }
   0x2   :  { %20 = vst [vmem:[#allocation5] sm:$0x1] %v19_v0 }
   0x3 LB: > { %s38_s9 = sadd.s32 1, %s2118_s28  ;;  %p1696_p0 = scmp.ge.s32.totalorder %s2122_s29, 1  ;;  %s2122_s29 = sphi %s2206_s29, %s26_s29   ;;  %s2118_s28 = sphi %s2204_s28, %s2588_s28   ;;  %s2114_s27 = sphi %s2202_s27, %s2587_s27  }
   0x4   : > { %p40_p1 = scmp.ge.s32.totalorder %s38_s9, 2  ;;  %p427_p2 = scmp.lt.s32.totalorder %s2122_s29, 3 }
   0x6   : > { %s2590_s9 = smov (%p40_p1, %s38_s9), 0  ;;  %p428_p3 = pnand %p1696_p0, %p427_p2 }
   0x7   : > { %s1697_s15 = sshll.u32 (!%p428_p3), %s2114_s27, 4  ;;  %p493_p5 = scmp.lt.s32.totalorder (!%p428_p3), %s2114_s27, 1 }
   0x8   : > { %431 = sbr.rel (%p428_p3) target bundleno = 1480 (0x5c8), region = 60  ;;  %p486_p4 = scmp.lt.s32.totalorder (!%p428_p3), %s1697_s15, 31 }
   0xd   : > { %v2008_v1 = vld [vmem:[%s2575_s2 + $0x74] ss:$8 sps:$4 sm:$0xff]   ;;  %v2010_v2 = vld [vmem:[%s2575_s2 + $0x70] ss:$8 sps:$4 sm:$0xff]   ;;  %v2124_v3 = vmov 0   ;;  %s2592_s15 = smov (!%p486_p4, %s1697_s15), 31  ;;  %v822_v47 = vlaneseq }
   0xe   : > { %712 = vmatprep.mubr.bf16.mxu0 %v2124_v3  ;;  %752 = vmatprep.mubr.bf16.mxu1 %v2124_v3  ;;  %v2011_v4 = vld [vmem:[%s2575_s2 + $0x64] ss:$8 sps:$4 sm:$0xff]   ;;  %v2013_v5 = vld [vmem:[%s2575_s2 + $0x60] ss:$8 sps:$4 sm:$0xff]   ;;  %v2014_v6 = vld [vmem:[%s2575_s2 + $0x54] ss:$8 sps:$4 sm:$0xff]  }
   0xf   : > { %680 = vmatprep.subr.bf16.mxu0 %v2008_v1  ;;  %1961 = vmatprep.subr.bf16.mxu1 %v2008_v1  ;;  %s1698_s24 = sshll.u32 %s2592_s15, 2  ;;  %v2016_v7 = vld [vmem:[%s2575_s2 + $0x50] ss:$8 sps:$4 sm:$0xff]   ;;  %v2017_v8 = vld [vmem:[%s2575_s2 + $0x44] ss:$8 sps:$4 sm:$0xff]   ;;  %v823_v49 = vshrl.u32 %v822_v47, 7 }
  0x10   : > { %681 = vmatpush1.bf16.msra.mxu0 %v2010_v2  ;;  %1969 = vmatpush1.bf16.msra.mxu1 %v2010_v2  ;;  %s2251_s18 = scalar_lea.vmem %s2573_s0, %s1698_s24  ;;  %v2019_v9 = vld [vmem:[%s2575_s2 + $0x40] ss:$8 sps:$4 sm:$0xff]   ;;  %v2020_v10 = vld [vmem:[%s2575_s2 + $0x34] ss:$8 sps:$4 sm:$0xff]   ;;  %v2022_v11 = vld [vmem:[%s2575_s2 + $0x30] ss:$8 sps:$4 sm:$0xff]  }
  0x11   : > { %682 = vmatprep.subr.bf16.mxu0 %v2011_v4  ;;  %1962 = vmatprep.subr.bf16.mxu1 %v2011_v4  ;;  %v2023_v12 = vld [vmem:[%s2575_s2 + $0x24] ss:$8 sps:$4 sm:$0xff]   ;;  %v2025_v13 = vld [vmem:[%s2575_s2 + $0x20] ss:$8 sps:$4 sm:$0xff]   ;;  %v2026_v14 = vld [vmem:[%s2575_s2 + $0x14] ss:$8 sps:$4 sm:$0xff]  }
  0x12   : > { %2006 = vset.pattern.permute.xlu0 %v2124_v3  ;;  %2007 = vset.pattern.permute.xlu1 %v2124_v3  ;;  %v2028_v15 = vld [vmem:[%s2575_s2 + $0x10] ss:$8 sps:$4 sm:$0xff]   ;;  %v2029_v16 = vld [vmem:[%s2575_s2 + $0x4] ss:$8 sps:$4 sm:$0xff]   ;;  %v2031_v17 = vld [vmem:[%s2575_s2] ss:$8 sps:$4 sm:$0xff]  }
  0x13   : > { %v2032_v18 = vld [vmem:[%s2251_s18] sm:$0xff]   ;;  %v2040_v20 = vld [vmem:[%s2577_s4 + $0x78] sm:$0xff]   ;;  %v2042_v22 = vld [vmem:[%s2577_s4 + $0x70] sm:$0xff]   ;;  %v2125_v45 = vmov 1966171168   ;;  %v2354_v57 = vsub.s32 0, %v823_v49 }
  0x14   : > { %683 = vmatpush1.bf16.msra.mxu0 %v2013_v5  ;;  %1970 = vmatpush1.bf16.msra.mxu1 %v2013_v5  ;;  %v2036_v19 = vld [vmem:[%s2251_s18 + $0x20] sm:$0xff]   ;;  %v2041_v21 = vld [vmem:[%s2577_s4 + $0x38] sm:$0xff]   ;;  %v2043_v23 = vld [vmem:[%s2577_s4 + $0x30] sm:$0xff]   ;;  %v820_v46 = vunpack.c.l.s4 %v2125_v45  ;;  %vm2127_vm0 = vmmov 0   ;;  %vm1331_vm1 = vcmask 523264   ;;  %vm516_vm2 = vcmask 0  }
  0x15   : > { %684 = vmatprep.subr.bf16.mxu0 %v2014_v6  ;;  %1963 = vmatprep.subr.bf16.mxu1 %v2014_v6  ;;  %v2044_v24 = vld [vmem:[%s2577_s4 + $0x68] sm:$0xff]   ;;  %v2046_v28 = vld [vmem:[%s2577_s4 + $0x60] sm:$0xff]   ;;  %v2048_v30 = vld [vmem:[%s2577_s4 + $0x58] sm:$0xff]   ;;  %s2594_s27 = smov (!%p493_p5, %s2114_s27), 1  ;;  %vm1457_vm3 = vcmask 1040384  }
  0x16   : > { %v2033_v25 = vld [vmem:[%s2251_s18 + $0x8] sm:$0xff]   ;;  %v2047_v29 = vld [vmem:[%s2577_s4 + $0x20] sm:$0xff]   ;;  %v2034_v31 = vld [vmem:[%s2251_s18 + $0x10] sm:$0xff]   ;;  %v821_v48 = vunpack.c.0.s8 %v820_v46  ;;  %s495_s26 = scalar_lea.vmem %s2574_s1, %s2594_s27  ;;  %s500_s16 = scalar_lea.vmem %s2583_s10, %s2594_s27 }
  0x17   : > { %v2037_v26 = vld [vmem:[%s2251_s18 + $0x28] sm:$0xff]   ;;  %v2038_v32 = vld [vmem:[%s2251_s18 + $0x30] sm:$0xff]   ;;  %v2049_v33 = vld [vmem:[%s2577_s4 + $0x18] sm:$0xff]   ;;  %s504_s15 = scalar_lea.vmem %s2584_s11, %s2594_s27  ;;  %s507_s22 = scalar_lea.vmem %s2585_s12, %s2594_s27 }
  0x18   : > { %685 = vmatpush1.bf16.msra.mxu0 %v2016_v7  ;;  %1971 = vmatpush1.bf16.msra.mxu1 %v2016_v7  ;;  %v2045_v27 = vld [vmem:[%s2577_s4 + $0x28] sm:$0xff]   ;;  %v2035_v34 = vld [vmem:[%s2251_s18 + $0x18] sm:$0xff]   ;;  %v2050_v36 = vld [vmem:[%s2577_s4 + $0x50] sm:$0xff]   ;;  %v824_v51 = vsub.s32 %v821_v48, %v823_v49 }
  0x19   : > { %686 = vmatprep.subr.bf16.mxu0 %v2017_v8  ;;  %1964 = vmatprep.subr.bf16.mxu1 %v2017_v8  ;;  %v2039_v35 = vld [vmem:[%s2251_s18 + $0x38] sm:$0xff]   ;;  %v2051_v37 = vld [vmem:[%s2577_s4 + $0x10] sm:$0xff]   ;;  %v2052_v38 = vld [vmem:[%s2577_s4 + $0x48] sm:$0xff]   ;;  %s510_s18 = scalar_lea.vmem %s2586_s13, %s2594_s27 }
  0x1a   : > { %v2053_v39 = vld [vmem:[%s2577_s4 + $0x8] sm:$0xff]   ;;  %v2054_v40 = vld [vmem:[%s2577_s4 + $0x40] sm:$0xff]   ;;  %v2056_v42 = vld [vmem:[%s2579_s6 + $0x38] sm:$0xff]  }
  0x1b   : > { %v2055_v41 = vld [vmem:[%s2577_s4] sm:$0xff]   ;;  %v2057_v43 = vld [vmem:[%s2579_s6 + $0x30] sm:$0xff]   ;;  %v2058_v44 = vld [vmem:[%s2579_s6 + $0x28] sm:$0xff]  }
  0x1c   : > { %687 = vmatpush1.bf16.msra.mxu0 %v2019_v9  ;;  %1972 = vmatpush1.bf16.msra.mxu1 %v2019_v9  ;;  %v1723_v50 = vld.sshfl [vmem:[%s2576_s3] sm:$0x11 pattern:$0x75316420] }
  0x1d   : > { %688 = vmatprep.subr.bf16.mxu0 %v2020_v10  ;;  %1965 = vmatprep.subr.bf16.mxu1 %v2020_v10  ;;  %v818_v52 = vcombine.high %v1723_v50, %v1723_v50  ;;  %v825_v53 = vrot.slane %v1723_v50, %v824_v51 }
  0x1f   : > { %v832_v54 = vrot.slane %v818_v52, %v824_v51  ;;  %v834_v56 = vpack.i.b16 %v825_v53, %v825_v53 }
  0x20   : > { %689 = vmatpush1.bf16.msra.mxu0 %v2022_v11  ;;  %1973 = vmatpush1.bf16.msra.mxu1 %v2022_v11 }
  0x21   : > { %690 = vmatprep.subr.bf16.mxu0 %v2023_v12  ;;  %1966 = vmatprep.subr.bf16.mxu1 %v2023_v12  ;;  %v841_v59 = vpack.i.b16 %v832_v54, %v832_v54  ;;  %v2359_v63 = vrot.slane %v834_v56, %v2354_v57 }
  0x23   : > { %v2364_v2 = vrot.slane %v841_v59, %v2354_v57 }
  0x24   : > { %691 = vmatpush1.bf16.msra.mxu0 %v2025_v13  ;;  %1974 = vmatpush1.bf16.msra.mxu1 %v2025_v13 }
  0x25   : > { %692 = vmatprep.subr.bf16.mxu0 %v2026_v14  ;;  %1967 = vmatprep.subr.bf16.mxu1 %v2026_v14 }
  0x28   : > { %693 = vmatpush1.bf16.msra.mxu0 %v2028_v15  ;;  %1975 = vmatpush1.bf16.msra.mxu1 %v2028_v15 }
  0x29   : > { %694 = vmatprep.subr.bf16.mxu0 %v2029_v16  ;;  %1968 = vmatprep.subr.bf16.mxu1 %v2029_v16 }
  0x2c   : > { %695 = vmatpush1.bf16.msra.mxu0 %v2031_v17  ;;  %1976 = vmatpush1.bf16.msra.mxu1 %v2031_v17 }
  0x2d   : > { %1768 = vmatprep.subr.bf16.mxu1 %v2040_v20  ;;  %1874 = vmatprep.subr.bf16.mxu0 %v2056_v42 }
  0x2f   : > { %713 = vmatmul.mubr.bf16.vlgmr.msra.gmra.mxu0 %v2032_v18  ;;  %753 = vmatmul.mubr.bf16.vlgmr.msra.gmra.mxu1 %v2036_v19 }
  0x30   : > { %722 = vmatprep.mubr.bf16.mxu0 %v2124_v3  ;;  %762 = vmatprep.mubr.bf16.mxu1 %v2124_v3 }
  0x31   : > { %1769 = vmatpush3.bf16.msra.mxu1 %v2041_v21  ;;  %1875 = vmatpush3.bf16.msra.mxu0 %v2056_v42 }
  0x32   : > { %1770 = vmatprep.subr.bf16.mxu1 %v2042_v22  ;;  %1876 = vmatprep.subr.bf16.mxu0 %v2057_v43 }
  0x35   : > { %1771 = vmatpush3.bf16.msra.mxu1 %v2043_v23  ;;  %1877 = vmatpush3.bf16.msra.mxu0 %v2057_v43 }
  0x36   : > { %1772 = vmatprep.subr.bf16.mxu1 %v2044_v24  ;;  %1878 = vmatprep.subr.bf16.mxu0 %v2058_v44 }
  0x37   : > { %723 = vmatmul.mubr.bf16.gmra.mxu0 %v2033_v25  ;;  %763 = vmatmul.mubr.bf16.gmra.mxu1 %v2037_v26 }
  0x38   : > { %732 = vmatprep.mubr.bf16.mxu0 %v2124_v3  ;;  %772 = vmatprep.mubr.bf16.mxu1 %v2124_v3 }
  0x39   : > { %1773 = vmatpush3.bf16.msra.mxu1 %v2045_v27  ;;  %1879 = vmatpush3.bf16.msra.mxu0 %v2058_v44 }
  0x3a   : > { %1774 = vmatprep.subr.bf16.mxu1 %v2046_v28 }
  0x3d   : > { %1775 = vmatpush3.bf16.msra.mxu1 %v2047_v29 }
  0x3e   : > { %1776 = vmatprep.subr.bf16.mxu1 %v2048_v30 }
  0x3f   : > { %733 = vmatmul.mubr.bf16.gmra.mxu0 %v2034_v31  ;;  %773 = vmatmul.mubr.bf16.gmra.mxu1 %v2038_v32 }
  0x40   : > { %742 = vmatprep.mubr.bf16.mxu0 %v2124_v3  ;;  %782 = vmatprep.mubr.bf16.mxu1 %v2124_v3 }
  0x41   : > { %1777 = vmatpush3.bf16.msra.mxu1 %v2049_v33 }
  0x42   : > { %1778 = vmatprep.subr.bf16.mxu1 %v2050_v36 }
  0x45   : > { %1779 = vmatpush3.bf16.msra.mxu1 %v2051_v37 }
  0x46   : > { %1780 = vmatprep.subr.bf16.mxu1 %v2052_v38 }
  0x47   : > { %743 = vmatmul.mubr.bf16.gmra.mxu0 %v2035_v34  ;;  %783 = vmatmul.mubr.bf16.gmra.mxu1 %v2039_v35 }
  0x49   : > { %1781 = vmatpush3.bf16.msra.mxu1 %v2053_v39 }
  0x4a   : > { %1782 = vmatprep.subr.bf16.mxu1 %v2054_v40 }
  0x4d   : > { %1783 = vmatpush3.bf16.msra.mxu1 %v2055_v41 }
  0xef   : > { %v714_v55 = vpop.f32.mrf.mxu0  ;;  %v2356_v58 = vpop.f32.mrf.mxu1 }
  0xf1   : > { %v716_v60 = vpop.f32.mrf.mxu0  ;;  %v756_v61 = vpop.f32.mrf.mxu1 }
  0xf3   : > { %v718_v62 = vpop.f32.mrf.mxu0  ;;  %v2361_v0 = vpop.f32.mrf.mxu1 }
  0xf4   : > { %v793_v1 = vpack.c.bf16 %v718_v62, %v714_v55  ;;  %v801_v52 = vpack.c.bf16 %v2361_v0, %v2356_v58 }
  0xf5   : > { %v720_v4 = vpop.f32.mrf.mxu0  ;;  %v760_v5 = vpop.f32.mrf.mxu1 }
  0xf6   : > { %v794_v6 = vpack.c.bf16 %v720_v4, %v716_v60  ;;  %v847_v7 = vadd.bf16 %v2359_v63, %v793_v1  ;;  %v802_v38 = vpack.c.bf16 %v760_v5, %v756_v61  ;;  %v855_v56 = vadd.bf16 %v2359_v63, %v801_v52 }
  0xf7   : > { %v724_v8 = vpop.f32.mrf.mxu0  ;;  %v2367_v9 = vpop.f32.mrf.mxu1 }
  0xf8   : > { %v848_v10 = vadd.bf16 %v2364_v2, %v794_v6  ;;  %v863_v14 = vmax.bf16 %v2124_v3, %v847_v7  ;;  %v856_v45 = vadd.bf16 %v2364_v2, %v802_v38  ;;  %v871_v1 = vmax.bf16 %v2124_v3, %v855_v56 }
  0xf9   : > { %v726_v11 = vpop.f32.mrf.mxu0  ;;  %v766_v12 = vpop.f32.mrf.mxu1 }
  0xfa   : > { %v864_v13 = vmax.bf16 %v2124_v3, %v848_v10  ;;  %v872_v50 = vmax.bf16 %v2124_v3, %v856_v45 }
  0xfb   : > { %v728_v15 = vpop.f32.mrf.mxu0  ;;  %v768_v16 = vpop.f32.mrf.mxu1 }
  0xfc   : > { %v795_v17 = vpack.c.bf16 %v728_v15, %v724_v8  ;;  %1039 = vmatprep.mubr.bf16.mxu1 %v864_v13  ;;  %v803_v62 = vpack.c.bf16 %v768_v16, %v2367_v9 }
  0xfd   : > { %v730_v18 = vpop.f32.mrf.mxu0  ;;  %1040 = vmatmul.mubr.bf16.vlgmr.msra.gmra.mxu1 %v863_v14  ;;  %v770_v22 = vpop.f32.mrf.mxu1 }
  0xfe   : > { %v796_v19 = vpack.c.bf16 %v730_v18, %v726_v11  ;;  %v849_v20 = vadd.bf16 %v2359_v63, %v795_v17  ;;  %v804_v51 = vpack.c.bf16 %v770_v22, %v766_v12  ;;  %v857_v0 = vadd.bf16 %v2359_v63, %v803_v62  ;;  %v2059_v17 = vld [vmem:[%s2579_s6 + $0x20] sm:$0xff]   ;;  %v2061_v18 = vld [vmem:[%s2579_s6 + $0x10] sm:$0xff]  }
  0xff   : > { %v734_v21 = vpop.f32.mrf.mxu0  ;;  %v774_v28 = vpop.f32.mrf.mxu1  ;;  %1880 = vmatprep.subr.bf16.mxu0 %v2059_v17  ;;  %v1112_v22 = vld [vmem:[%s2578_s5] sm:$0x1] }
 0x100   : > { %v850_v23 = vadd.bf16 %v2364_v2, %v796_v19  ;;  %v865_v27 = vmax.bf16 %v2124_v3, %v849_v20  ;;  %v858_v55 = vadd.bf16 %v2364_v2, %v804_v51  ;;  %v873_v10 = vmax.bf16 %v2124_v3, %v857_v0  ;;  %1881 = vmatpush3.bf16.msra.mxu0 %v2059_v17  ;;  %v2063_v19 = vld [vmem:[%s2579_s6] sm:$0xff]  }
 0x101   : > { %v736_v24 = vpop.f32.mrf.mxu0  ;;  %v776_v34 = vpop.f32.mrf.mxu1  ;;  %v2126_v20 = vmov 0.0  }
 0x102   : > { %v866_v25 = vmax.bf16 %v2124_v3, %v850_v23  ;;  %v874_v60 = vmax.bf16 %v2124_v3, %v858_v55  ;;  %519 = vst [vmem:[#allocation4] sm:$0x1] %v2126_v20  ;;  %1906 = vmatprep.subr.mxu1 %v2126_v20  ;;  %518 = vst.msk [vmem:[#allocation3] sm:$0x1] %vm516_vm2, %v2126_v20 }
 0x103   : > { %v738_v26 = vpop.f32.mrf.mxu0  ;;  %v778_v41 = vpop.f32.mrf.mxu1 }
 0x104   : > { %v797_v29 = vpack.c.bf16 %v738_v26, %v734_v21  ;;  %1047 = vmatprep.mubr.bf16.mxu1 %v866_v25  ;;  %v805_v8 = vpack.c.bf16 %v778_v41, %v774_v28 }
 0x105   : > { %v740_v30 = vpop.f32.mrf.mxu0  ;;  %1048 = vmatmul.mubr.bf16.gmra.mxu1 %v865_v27  ;;  %v780_v47 = vpop.f32.mrf.mxu1 }
 0x106   : > { %v798_v31 = vpack.c.bf16 %v740_v30, %v736_v24  ;;  %v851_v32 = vadd.bf16 %v2359_v63, %v797_v29  ;;  %v806_v61 = vpack.c.bf16 %v780_v47, %v776_v34  ;;  %v859_v11 = vadd.bf16 %v2359_v63, %v805_v8 }
 0x107   : > { %v744_v33 = vpop.f32.mrf.mxu0  ;;  %v784_v54 = vpop.f32.mrf.mxu1  ;;  %v1114_v24 = vpack.i.b16 %v1112_v22, %v1112_v22 }
 0x108   : > { %v852_v35 = vadd.bf16 %v2364_v2, %v798_v31  ;;  %v867_v40 = vmax.bf16 %v2124_v3, %v851_v32  ;;  %v860_v58 = vadd.bf16 %v2364_v2, %v806_v61  ;;  %v875_v14 = vmax.bf16 %v2124_v3, %v859_v11 }
 0x109   : > { %v746_v36 = vpop.f32.mrf.mxu0  ;;  %v786_v59 = vpop.f32.mrf.mxu1  ;;  %v2425_v29 = vrot.slane %v1114_v24, %v2354_v57 }
 0x10a   : > { %v868_v37 = vmax.bf16 %v2124_v3, %v852_v35  ;;  %v876_v6 = vmax.bf16 %v2124_v3, %v860_v58 }
 0x10b   : > { %v748_v39 = vpop.f32.mrf.mxu0  ;;  %v788_v4 = vpop.f32.mrf.mxu1 }
 0x10c   : > { %v799_v42 = vpack.c.bf16 %v748_v39, %v744_v33  ;;  %1055 = vmatprep.mubr.bf16.mxu1 %v868_v37  ;;  %v807_v13 = vpack.c.bf16 %v788_v4, %v784_v54 }
 0x10d   : > { %v750_v43 = vpop.f32.mrf.mxu0  ;;  %1056 = vmatmul.mubr.bf16.gmra.mxu1 %v867_v40  ;;  %v790_v5 = vpop.f32.mrf.mxu1 }
 0x10e   : > { %v800_v44 = vpack.c.bf16 %v750_v43, %v746_v36  ;;  %v853_v46 = vadd.bf16 %v2359_v63, %v799_v42  ;;  %v808_v7 = vpack.c.bf16 %v790_v5, %v786_v59  ;;  %v861_v15 = vadd.bf16 %v2359_v63, %v807_v13  ;;  %v2062_v63 = vld [vmem:[%s2579_s6 + $0x8] sm:$0xff]  }
 0x110   : > { %v854_v48 = vadd.bf16 %v2364_v2, %v800_v44  ;;  %v869_v53 = vmax.bf16 %v2124_v3, %v853_v46  ;;  %v862_v9 = vadd.bf16 %v2364_v2, %v808_v7  ;;  %v877_v16 = vmax.bf16 %v2124_v3, %v861_v15  ;;  %v2060_v2 = vld [vmem:[%s2579_s6 + $0x18] sm:$0xff]  }
 0x111   : > { %1882 = vmatprep.subr.bf16.mxu0 %v2060_v2 }
 0x112   : > { %v870_v49 = vmax.bf16 %v2124_v3, %v854_v48  ;;  %v878_v12 = vmax.bf16 %v2124_v3, %v862_v9  ;;  %1883 = vmatpush3.bf16.msra.mxu0 %v2060_v2 }
 0x113   : > { %1884 = vmatprep.subr.bf16.mxu0 %v2061_v18 }
 0x114   : > { %1063 = vmatprep.mubr.bf16.mxu1 %v870_v49 }
 0x115   : > { %1064 = vmatmul.mubr.bf16.gmra.mxu1 %v869_v53 }
 0x116   : > { %1071 = vmatprep.mubr.bf16.mxu1 %v872_v50  ;;  %1885 = vmatpush3.bf16.msra.mxu0 %v2061_v18 }
 0x117   : > { %1886 = vmatprep.subr.bf16.mxu0 %v2062_v63 }
 0x11a   : > { %1887 = vmatpush3.bf16.msra.mxu0 %v2062_v63 }
 0x11b   : > { %1888 = vmatprep.subr.bf16.mxu0 %v2063_v19 }
 0x11d   : > { %1072 = vmatmul.mubr.bf16.gmra.mxu1 %v871_v1 }
 0x11e   : > { %1079 = vmatprep.mubr.bf16.mxu1 %v874_v60  ;;  %1889 = vmatpush3.bf16.msra.mxu0 %v2063_v19 }
 0x11f   : > { %1941 = vmatprep.subr.bf16.mxu0 %v2126_v20 }
 0x125   : > { %1080 = vmatmul.mubr.bf16.gmra.mxu1 %v873_v10 }
 0x126   : > { %1087 = vmatprep.mubr.bf16.mxu1 %v876_v6 }
 0x12d   : > { %1088 = vmatmul.mubr.bf16.gmra.mxu1 %v875_v14 }
 0x12e   : > { %1095 = vmatprep.mubr.bf16.mxu1 %v878_v12 }
 0x135   : > { %1096 = vmatmul.mubr.bf16.gmra.mxu1 %v877_v16 }
 0x136   : > { %1938 = vmatprep.mubr.msk.f32.mxu1 %vm2127_vm0, %v2126_v20 }
 0x1bd   : > { %v1784_v21 = vpop.f32.mrf.mxu1 }
 0x1bf   : > { %v1785_v23 = vpop.f32.mrf.mxu1 }
 0x1c0   : > { %v1786_v27 = vadd.f32 %v1785_v23, %v1784_v21 }
 0x1c1   : > { %v1787_v25 = vpop.f32.mrf.mxu1 }
 0x1c3   : > { %v1788_v26 = vpop.f32.mrf.mxu1 }
 0x1c4   : > { %v1789_v28 = vadd.f32 %v1788_v26, %v1787_v25 }
 0x1c5   : > { %v1790_v30 = vpop.f32.mrf.mxu1 }
 0x1c6   : > { %v1104_v31 = vpack.c.bf16 %v1789_v28, %v1786_v27 }
 0x1c7   : > { %v1791_v32 = vpop.f32.mrf.mxu1 }
 0x1c8   : > { %v1120_v33 = vadd.bf16 %v2425_v29, %v1104_v31  ;;  %v1792_v37 = vadd.f32 %v1791_v32, %v1790_v30 }
 0x1c9   : > { %v1793_v34 = vpop.f32.mrf.mxu1 }
 0x1ca   : > { %v2429_v35 = vmax.bf16 %v2124_v3, %v1120_v33 }
 0x1cb   : > { %v1794_v36 = vpop.f32.mrf.mxu1 }
 0x1cc   : > { %v1795_v38 = vadd.f32 %v1794_v36, %v1793_v34  ;;  %1890 = vmatprep.mubr.bf16.mxu0 %v2429_v35 }
 0x1cd   : > { %v1796_v39 = vpop.f32.mrf.mxu1 }
 0x1ce   : > { %v1105_v40 = vpack.c.bf16 %v1795_v38, %v1792_v37 }
 0x1cf   : > { %v1797_v41 = vpop.f32.mrf.mxu1 }
 0x1d0   : > { %v1121_v42 = vadd.bf16 %v2425_v29, %v1105_v40  ;;  %v1798_v46 = vadd.f32 %v1797_v41, %v1796_v39 }
 0x1d1   : > { %v1799_v43 = vpop.f32.mrf.mxu1 }
 0x1d2   : > { %v2434_v44 = vmax.bf16 %v2124_v3, %v1121_v42 }
 0x1d3   : > { %v1800_v45 = vpop.f32.mrf.mxu1 }
 0x1d4   : > { %v1801_v47 = vadd.f32 %v1800_v45, %v1799_v43  ;;  %1891 = vmatmul.mubr.bf16.vlgmr.msra.gmra.mxu0 %v2434_v44 }
 0x1d5   : > { %v1802_v48 = vpop.f32.mrf.mxu1 }
 0x1d6   : > { %v1106_v49 = vpack.c.bf16 %v1801_v47, %v1798_v46 }
 0x1d7   : > { %v1803_v50 = vpop.f32.mrf.mxu1 }
 0x1d8   : > { %v1122_v51 = vadd.bf16 %v2425_v29, %v1106_v49  ;;  %v1804_v55 = vadd.f32 %v1803_v50, %v1802_v48  ;;  %v2471_v49 = vld [vmem:[%s2580_s7] ss:$0 sm:$0xff] }
 0x1d9   : > { %v1805_v52 = vpop.f32.mrf.mxu1 }
 0x1da   : > { %v1130_v53 = vmax.bf16 %v2124_v3, %v1122_v51 }
 0x1db   : > { %v1806_v54 = vpop.f32.mrf.mxu1 }
 0x1dc   : > { %v1807_v56 = vadd.f32 %v1806_v54, %v1805_v52  ;;  %1894 = vmatprep.mubr.bf16.mxu0 %v1130_v53 }
 0x1dd   : > { %v1808_v59 = vpop.f32.mrf.mxu1 }
 0x1de   : > { %v1107_v60 = vpack.c.bf16 %v1807_v56, %v1804_v55 }
 0x1df   : > { %v1809_v61 = vpop.f32.mrf.mxu1 }
 0x1e0   : > { %v1123_v62 = vadd.bf16 %v2425_v29, %v1107_v60  ;;  %v1810_v0 = vadd.f32 %v1809_v61, %v1808_v59 }
 0x1e1   : > { %v1811_v1 = vpop.f32.mrf.mxu1 }
 0x1e2   : > { %v1131_v4 = vmax.bf16 %v2124_v3, %v1123_v62 }
 0x1e3   : > { %v1812_v58 = vpop.f32.mrf.mxu1 }
 0x1e4   : > { %v1813_v5 = vadd.f32 %v1812_v58, %v1811_v1  ;;  %1895 = vmatmul.mubr.bf16.gmra.mxu0 %v1131_v4 }
 0x1e5   : > { %v1814_v6 = vpop.f32.mrf.mxu1 }
 0x1e6   : > { %v1108_v7 = vpack.c.bf16 %v1813_v5, %v1810_v0 }
 0x1e7   : > { %v1815_v8 = vpop.f32.mrf.mxu1 }
 0x1e8   : > { %v1124_v10 = vadd.bf16 %v2425_v29, %v1108_v7  ;;  %v1816_v13 = vadd.f32 %v1815_v8, %v1814_v6 }
 0x1e9   : > { %v1817_v9 = vpop.f32.mrf.mxu1 }
 0x1ea   : > { %v1132_v11 = vmax.bf16 %v2124_v3, %v1124_v10 }
 0x1eb   : > { %v1818_v12 = vpop.f32.mrf.mxu1 }
 0x1ec   : > { %v1819_v14 = vadd.f32 %v1818_v12, %v1817_v9  ;;  %1898 = vmatprep.mubr.bf16.mxu0 %v1132_v11 }
 0x1ed   : > { %v1820_v15 = vpop.f32.mrf.mxu1 }
 0x1ee   : > { %v1109_v16 = vpack.c.bf16 %v1819_v14, %v1816_v13 }
 0x1ef   : > { %v1821_v17 = vpop.f32.mrf.mxu1 }
 0x1f0   : > { %v1125_v2 = vadd.bf16 %v2425_v29, %v1109_v16  ;;  %v1822_v21 = vadd.f32 %v1821_v17, %v1820_v15 }
 0x1f1   : > { %v1823_v18 = vpop.f32.mrf.mxu1 }
 0x1f2   : > { %v1133_v63 = vmax.bf16 %v2124_v3, %v1125_v2 }
 0x1f3   : > { %v1824_v19 = vpop.f32.mrf.mxu1 }
 0x1f4   : > { %v1825_v22 = vadd.f32 %v1824_v19, %v1823_v18  ;;  %1899 = vmatmul.mubr.bf16.gmra.mxu0 %v1133_v63 }
 0x1f5   : > { %v1826_v23 = vpop.f32.mrf.mxu1 }
 0x1f6   : > { %v1110_v24 = vpack.c.bf16 %v1825_v22, %v1822_v21 }
 0x1f7   : > { %v1827_v25 = vpop.f32.mrf.mxu1 }
 0x1f8   : > { %v1126_v26 = vadd.bf16 %v2425_v29, %v1110_v24  ;;  %v1828_v31 = vadd.f32 %v1827_v25, %v1826_v23  ;;  %v1320_v23 = vld [vmem:[%s2581_s8] sm:$0x1]  ;;  %v2128_v24 = vmov -1e+30  }
 0x1f9   : > { %v1829_v27 = vpop.f32.mrf.mxu1  ;;  %517 = vst.msk [vmem:[#allocation2] sm:$0x1] %vm516_vm2, %v2128_v24 }
 0x1fa   : > { %v1134_v28 = vmax.bf16 %v2124_v3, %v1126_v26 }
 0x1fb   : > { %v1830_v30 = vpop.f32.mrf.mxu1 }
 0x1fc   : > { %v1831_v32 = vadd.f32 %v1830_v30, %v1829_v27  ;;  %1902 = vmatprep.mubr.bf16.mxu0 %v1134_v28 }
 0x1fe   : > { %v1111_v33 = vpack.c.bf16 %v1831_v32, %v1828_v31 }
 0x200   : > { %v1127_v34 = vadd.bf16 %v2425_v29, %v1111_v33  ;;  %v1456_v33 = vld [vmem:[#allocation2] sm:$0x1] }
 0x202   : > { %v1135_v36 = vmax.bf16 %v2124_v3, %v1127_v34  ;;  %v1321_v3 = vld [vmem:[#allocation5] sm:$0x1] }
 0x203   : > { %1324 = vperm.xlu0 %2006, %v1321_v3  }
 0x204   : > { %1903 = vmatmul.mubr.bf16.gmra.mxu0 %v1135_v36 }
 0x205   : > { %1942 = vmatpush3.bf16.msra.mxu0 %v1135_v36  ;;  %1957 = vmatprep.mubr.msk.bf16.mxu0 %vm2127_vm0, %v2126_v20 }
 0x206   : > { %1943 = vmatprep.subr.bf16.mxu0 %v2126_v20 }
 0x209   : > { %1944 = vmatpush3.bf16.msra.mxu0 %v1134_v28  ;;  %v1453_v28 = vld [vmem:[%s495_s26] sm:$0x1] }
 0x20a   : > { %1945 = vmatprep.subr.bf16.mxu0 %v2126_v20 }
 0x20d   : > { %1946 = vmatpush3.bf16.msra.mxu0 %v1133_v63 }
 0x20e   : > { %1947 = vmatprep.subr.bf16.mxu0 %v2126_v20 }
 0x211   : > { %1948 = vmatpush3.bf16.msra.mxu0 %v1132_v11 }
 0x212   : > { %1949 = vmatprep.subr.bf16.mxu0 %v2126_v20 }
 0x215   : > { %1950 = vmatpush3.bf16.msra.mxu0 %v1131_v4 }
 0x216   : > { %1951 = vmatprep.subr.bf16.mxu0 %v2126_v20 }
 0x219   : > { %1952 = vmatpush3.bf16.msra.mxu0 %v1130_v53 }
 0x21a   : > { %1953 = vmatprep.subr.bf16.mxu0 %v2126_v20 }
 0x21d   : > { %1954 = vmatpush3.bf16.msra.mxu0 %v2434_v44 }
 0x21e   : > { %1955 = vmatprep.subr.bf16.mxu0 %v2126_v20 }
 0x221   : > { %1956 = vmatpush3.bf16.msra.mxu0 %v2429_v35 }
 0x27e   : > { %v1325_v25 = vpop.permute.xlu0 %1324 }
 0x27f   : > { %v1330_v26 = vrot.slane %v1325_v25, %v2354_v57 }
 0x294   : > { %v2460_v29 = vpop.f32.mrf.mxu0 }
 0x295   : > { %v1250_v14 = vadd.f32 %v2460_v29, %v2471_v49 }
 0x296   : > { %v2462_v37 = vpop.f32.mrf.mxu0 }
 0x297   : > { %v1242_v2 = vadd.f32 %v2471_v49, %v2462_v37 }
 0x298   : > { %v2464_v38 = vpop.f32.mrf.mxu0 }
 0x299   : > { %v1253_v12 = vadd.f32 %v2464_v38, %v2471_v49 }
 0x29a   : > { %v2466_v39 = vpop.f32.mrf.mxu0 }
 0x29b   : > { %v1245_v16 = vadd.f32 %v2471_v49, %v2466_v39 }
 0x2a4   : > { %v1896_v40 = vpop.f32.mrf.mxu0 }
 0x2a5   : > { %v1266_v6 = vadd.f32 %v1896_v40, %v2471_v49 }
 0x2a6   : > { %v1257_v41 = vpop.f32.mrf.mxu0 }
 0x2a7   : > { %v1258_v9 = vadd.f32 %v2471_v49, %v1257_v41 }
 0x2a8   : > { %v1897_v42 = vpop.f32.mrf.mxu0 }
 0x2a9   : > { %v1269_v0 = vadd.f32 %v1897_v42, %v2471_v49 }
 0x2aa   : > { %v1260_v43 = vpop.f32.mrf.mxu0 }
 0x2ab   : > { %v1261_v8 = vadd.f32 %v2471_v49, %v1260_v43 }
 0x2b4   : > { %v1900_v35 = vpop.f32.mrf.mxu0 }
 0x2b5   : > { %v1282_v60 = vadd.f32 %v1900_v35, %v2471_v49 }
 0x2b6   : > { %v1273_v44 = vpop.f32.mrf.mxu0 }
 0x2b7   : > { %v1274_v4 = vadd.f32 %v2471_v49, %v1273_v44 }
 0x2b8   : > { %v1901_v45 = vpop.f32.mrf.mxu0 }
 0x2b9   : > { %v1285_v56 = vadd.f32 %v1901_v45, %v2471_v49  ;;  %v1477_v45 = vld [vmem:[#allocation3] sm:$0x1] }
 0x2ba   : > { %v1276_v46 = vpop.f32.mrf.mxu0 }
 0x2bb   : > { %v1277_v62 = vadd.f32 %v2471_v49, %v1276_v46 }
 0x2c4   : > { %v1904_v47 = vpop.f32.mrf.mxu0 }
 0x2c5   : > { %v1298_v52 = vadd.f32 %v1904_v47, %v2471_v49 }
 0x2c6   : > { %v1289_v48 = vpop.f32.mrf.mxu0 }
 0x2c7   : > { %v1290_v55 = vadd.f32 %v2471_v49, %v1289_v48 }
 0x2c8   : > { %v1905_v50 = vpop.f32.mrf.mxu0 }
 0x2c9   : > { %v1301_v51 = vadd.f32 %v1905_v50, %v2471_v49 }
 0x2ca   : > { %v1292_v53 = vpop.f32.mrf.mxu0 }
 0x2cb   : > { %2064 = vtanh.f32 %v1301_v51  ;;  %v1293_v54 = vadd.f32 %v2471_v49, %v1292_v53 }
 0x2cc   : > { %2066 = vtanh.f32 %v1298_v52  ;;  %v1485_v52 = vld [vmem:[#allocation4] sm:$0x1] }
 0x2cd   : > { %2068 = vtanh.f32 %v1293_v54 }
 0x2ce   : > { %2070 = vtanh.f32 %v1290_v55 }
 0x2cf   : > { %2072 = vtanh.f32 %v1285_v56 }
 0x2d0   : > { %2074 = vtanh.f32 %v1282_v60 }
 0x2d1   : > { %2076 = vtanh.f32 %v1277_v62 }
 0x2d2   : > { %2078 = vtanh.f32 %v1274_v4 }
 0x2d3   : > { %2080 = vtanh.f32 %v1269_v0 }
 0x2d4   : > { %2082 = vtanh.f32 %v1266_v6 }
 0x2d5   : > { %2084 = vtanh.f32 %v1261_v8 }
 0x2d6   : > { %2086 = vtanh.f32 %v1258_v9 }
 0x2d7   : > { %2088 = vtanh.f32 %v1253_v12 }
 0x2d8   : > { %v2065_v59 = vpop.eup %2064  ;;  %2090 = vtanh.f32 %v1250_v14 }
 0x2d9   : > { %1907 = vmatpush3.xpose.msk.msra.mxu1 %vm1331_vm1, %v2065_v59  ;;  %v2067_v61 = vpop.eup %2066  ;;  %2092 = vtanh.f32 %v1245_v16 }
 0x2da   : > { %1908 = vmatprep.subr.mxu1 %v2126_v20  ;;  %v2069_v1 = vpop.eup %2068  ;;  %2094 = vtanh.f32 %v1242_v2 }
 0x2db   : > { %v2071_v58 = vpop.eup %2070 }
 0x2dc   : > { %v2073_v5 = vpop.eup %2072 }
 0x2dd   : > { %1909 = vmatpush3.xpose.msk.msra.mxu1 %vm1331_vm1, %v2067_v61  ;;  %v2075_v7 = vpop.eup %2074 }
 0x2de   : > { %1910 = vmatprep.subr.mxu1 %v2126_v20  ;;  %v2077_v10 = vpop.eup %2076 }
 0x2df   : > { %v2079_v11 = vpop.eup %2078 }
 0x2e0   : > { %v2081_v13 = vpop.eup %2080 }
 0x2e1   : > { %1911 = vmatpush3.xpose.msk.msra.mxu1 %vm1331_vm1, %v2069_v1  ;;  %v2083_v15 = vpop.eup %2082 }
 0x2e2   : > { %1912 = vmatprep.subr.mxu1 %v2126_v20  ;;  %v2085_v17 = vpop.eup %2084 }
 0x2e3   : > { %v2087_v18 = vpop.eup %2086 }
 0x2e4   : > { %v2089_v63 = vpop.eup %2088 }
 0x2e5   : > { %1913 = vmatpush3.xpose.msk.msra.mxu1 %vm1331_vm1, %v2071_v58  ;;  %v2091_v19 = vpop.eup %2090 }
 0x2e6   : > { %1914 = vmatprep.subr.mxu1 %v2126_v20  ;;  %v2093_v21 = vpop.eup %2092 }
 0x2e7   : > { %v2095_v22 = vpop.eup %2094 }
 0x2e9   : > { %1915 = vmatpush3.xpose.msk.msra.mxu1 %vm1331_vm1, %v2073_v5 }
 0x2ea   : > { %1916 = vmatprep.subr.mxu1 %v2126_v20 }
 0x2ed   : > { %1917 = vmatpush3.xpose.msk.msra.mxu1 %vm1331_vm1, %v2075_v7 }
 0x2ee   : > { %1918 = vmatprep.subr.mxu1 %v2126_v20 }
 0x2f1   : > { %1919 = vmatpush3.xpose.msk.msra.mxu1 %vm1331_vm1, %v2077_v10 }
 0x2f2   : > { %1920 = vmatprep.subr.mxu1 %v2126_v20 }
 0x2f5   : > { %1921 = vmatpush3.xpose.msk.msra.mxu1 %vm1331_vm1, %v2079_v11 }
 0x2f6   : > { %1922 = vmatprep.subr.mxu1 %v2126_v20 }
 0x2f9   : > { %1923 = vmatpush3.xpose.msk.msra.mxu1 %vm1331_vm1, %v2081_v13 }
 0x2fa   : > { %1924 = vmatprep.subr.mxu1 %v2126_v20 }
 0x2fd   : > { %1925 = vmatpush3.xpose.msk.msra.mxu1 %vm1331_vm1, %v2083_v15 }
 0x2fe   : > { %1926 = vmatprep.subr.mxu1 %v2126_v20 }
 0x301   : > { %1927 = vmatpush3.xpose.msk.msra.mxu1 %vm1331_vm1, %v2085_v17 }
 0x302   : > { %1928 = vmatprep.subr.mxu1 %v2126_v20 }
 0x305   : > { %1929 = vmatpush3.xpose.msk.msra.mxu1 %vm1331_vm1, %v2087_v18 }
 0x306   : > { %1930 = vmatprep.subr.mxu1 %v2126_v20 }
 0x309   : > { %1931 = vmatpush3.xpose.msk.msra.mxu1 %vm1331_vm1, %v2089_v63 }
 0x30a   : > { %1932 = vmatprep.subr.mxu1 %v2126_v20 }
 0x30d   : > { %1933 = vmatpush3.xpose.msk.msra.mxu1 %vm1331_vm1, %v2091_v19 }
 0x30e   : > { %1934 = vmatprep.subr.mxu1 %v2126_v20 }
 0x311   : > { %1935 = vmatpush3.xpose.msk.msra.mxu1 %vm1331_vm1, %v2093_v21 }
 0x312   : > { %1936 = vmatprep.subr.mxu1 %v2126_v20 }
 0x315   : > { %1937 = vmatpush3.xpose.msk.msra.mxu1 %vm1331_vm1, %v2095_v22 }
 0x318   : > { %1939 = vmatmul.mubr.msk.f32.vlgmr.msra.gmra.mxu1 %vm1331_vm1, %v1320_v23 }
 0x3d8   : > { %v1449_v27 = vpop.f32.mrf.mxu1 }
 0x3d9   : > { %v1450_v30 = vadd.f32 %v1449_v27, %v1330_v26 }
 0x3da   : > { %v1940_v20 = vpop.f32.mrf.mxu1 }
 0x3db   : > { %v1454_v31 = vadd.f32 %v1453_v28, %v1450_v30 }
 0x3dd   : > { %1455 = vst [vmem:[%s500_s16] sm:$0x1] %v1454_v31  ;;  %v1458_v32 = vsel %vm1457_vm3, %v1454_v31, -inf }
 0x3de   : > { %1459 = vmax.xlane.f32.xlu0 %v1458_v32 }
 0x467   : > { %v1460_v34 = vpop.xlane.xlu0 %1459 }
 0x468   : > { %v1461_v36 = vmax.f32 %v1456_v33, %v1460_v34 }
 0x46a   : > { %v1462_v3 = vsub.f32 %v1456_v33, %v1461_v36  ;;  %1539 = vst.msk [vmem:[#allocation2] sm:$0x1] %vm516_vm2, %v1461_v36  ;;  %1467 = vperm.xlu1 %2007, %v1461_v36  }
 0x46c   : > { %v1463_v29 = vmul.f32 1.442695, %v1462_v3 }
 0x46e   : > { %2096 = vpow2.f32 %v1463_v29 }
 0x471   : > { %v1543_v37 = vld [vmem:[#allocation2] sm:$0x1] }
 0x472   : > { %1544 = vst.msk [vmem:[%s504_s15] sm:$0x1] %vm516_vm2, %v1543_v37 }
 0x47b   : > { %v2097_v38 = vpop.eup %2096 }
 0x47c   : > { %1488 = vperm.xlu0 %2006, %v2097_v38   ;;  %v1478_v46 = vmul.f32 %v2097_v38, %v1477_v45 }
 0x4e5   : > { %v1468_v39 = vpop.permute.xlu1 %1467 }
 0x4e6   : > { %v1473_v40 = vrot.slane %v1468_v39, %v2354_v57 }
 0x4e8   : > { %v1474_v41 = vsub.f32 %v1454_v31, %v1473_v40 }
 0x4ea   : > { %v1475_v42 = vmul.f32 1.442695, %v1474_v41 }
 0x4ec   : > { %2098 = vpow2.f32 %v1475_v42 }
 0x4f7   : > { %v1489_v50 = vpop.permute.xlu0 %1488 }
 0x4f8   : > { %v1494_v51 = vrot.slane %v1489_v50, %v2354_v57 }
 0x4f9   : > { %v2099_v43 = vpop.eup %2098 }
 0x4fa   : > { %v1479_v35 = vsel %vm1457_vm3, %v2099_v43, 0.0  ;;  %v1496_v44 = vpack.c.bf16 %v2099_v43, %v2099_v43  ;;  %v1495_v53 = vmul.f32 %v1494_v51, %v1485_v52 }
 0x4fb   : > { %1480 = vadd.xlane.f32.xlu1 %v1479_v35 }
 0x4fc   : > { %1958 = vmatmul.mubr.bf16.vlgmr.msra.gmra.mxu0 %v1496_v44 }
 0x584   : > { %v1481_v47 = vpop.xlane.xlu1 %1480 }
 0x585   : > { %v1482_v48 = vadd.f32 %v1481_v47, %v1478_v46 }
 0x587   : > { %1484 = vst.msk [vmem:[#allocation3] sm:$0x1] %vm516_vm2, %v1482_v48 }
 0x58e   : > { %v1545_v49 = vld [vmem:[#allocation3] sm:$0x1] }
 0x58f   : > { %1546 = vst.msk [vmem:[%s507_s22] sm:$0x1] %vm516_vm2, %v1545_v49 }
 0x5bc   : > { %v1531_v54 = vpop.f32.mrf.mxu0 }
 0x5bd   : > { %v1537_v55 = vadd.f32 %v1531_v54, %v1495_v53 }
 0x5be   : > { %v1959_v56 = vpop.f32.mrf.mxu0 }
 0x5bf   : > { %1538 = vst [vmem:[#allocation4] sm:$0x1] %v1537_v55 }
 0x5c0   : > { %v1534_v59 = vpop.f32.mrf.mxu0 }
 0x5c2   : > { %v1960_v60 = vpop.f32.mrf.mxu0 }
 0x5c6   : > { %v1547_v61 = vld [vmem:[#allocation4] sm:$0x1] }
 0x5c7   : > { %1548 = vst [vmem:[%s510_s18] sm:$0x1] %v1547_v61 }
 0x5c8 PF: > { %s26_s29 = sadd.s32 1, %s2122_s29   ;;  %s2587_s27 = smov %s2118_s28 }
 0x5c9   : > { %p23_p6 = scmp.ge.s32.totalorder %s26_s29, 4   ;;  %s2588_s28 = smov %s2590_s9 }
 0x5cb   :  { %25 = sbr.rel (!%p23_p6) target bundleno = 3 (0x3), region = 137 }

</bundles_post_ra>
